<compile_context>
chip_gen: v7x
topology: tpu7x:2x2x1
jax: 0.10.0
libtpu: 0.0.40
codegen_flags: <defaults>
</compile_context>

<pallas_src>
import functools

import jax
import jax.numpy as jnp
import numpy as np
from jax.experimental import pallas as pl
from jax.experimental.pallas import tpu as pltpu

LN_EPS = 1e-5


def _axial_attention_kernel(q_in_ref, k_in_ref, gamma_ref, beta_ref,
                            wq_ref, bq_ref, wkv_ref, bkv_ref,
                            wo_ref, bo_ref, o_ref,
                            *, heads, dim_head):
  bt, nq, dim = q_in_ref.shape        # query tile: (block_b, block_q, dim)
  nk = k_in_ref.shape[1]              # key tile:   (block_b, n, dim)
  in_dim = heads * dim_head

  xq = q_in_ref[...].reshape(bt * nq, dim)     # f32
  xk = k_in_ref[...].reshape(bt * nk, dim)
  gamma = gamma_ref[...]                       # (1, dim)
  beta = beta_ref[...]                         # (1, dim)

  def layernorm(x):
    mu = jnp.mean(x, axis=-1, keepdims=True)
    var = jnp.mean(jnp.square(x - mu), axis=-1, keepdims=True)
    return (x - mu) * jax.lax.rsqrt(var + LN_EPS) * gamma + beta

  # LN in f32 on the VPU, cast to bf16 only at the MXU boundary.
  xq_b = layernorm(xq).astype(jnp.bfloat16)
  xk_b = layernorm(xk).astype(jnp.bfloat16)

  # Q projection (1/sqrt(dh) scale pre-folded into wq/bq in the wrapper) and
  # fused KV projection: one matmul against [Wk | Wv] of shape (dim, 2*in_dim).
  q = (jnp.dot(xq_b, wq_ref[...], preferred_element_type=jnp.float32)
       + bq_ref[...]).astype(jnp.bfloat16)                      # (bt*nq, in_dim)
  kv = (jnp.dot(xk_b, wkv_ref[...], preferred_element_type=jnp.float32)
        + bkv_ref[...])                                         # (bt*nk, 2*in_dim) f32
  v = kv[:, in_dim:].astype(jnp.bfloat16)                       # (bt*nk, in_dim)

  # Per-(batch-row, head) attention.  Head outputs are concatenated into one
  # lane-dense (rows, in_dim) slab (no masked per-head scratch stores) and the
  # output projection is a single wide matmul against the full Wo.
  row_outs = []
  for bi in range(bt):
    q_rows = slice(bi * nq, (bi + 1) * nq)
    k_rows = slice(bi * nk, (bi + 1) * nk)
    # Hoisted transpose: one XLU transpose per batch row instead of one per
    # head inside the dot_general.  f32 so dim_head-row slices stay on 8-row
    # sublane-tile boundaries.
    kt = kv[k_rows, :in_dim].T                                  # (in_dim, nk) f32
    head_outs = []
    for h in range(heads):
      cols = slice(h * dim_head, (h + 1) * dim_head)
      qh = q[q_rows, cols]                                      # (nq, dh) bf16 (scaled)
      kh_t = kt[cols, :].astype(jnp.bfloat16)                   # (dh, nk) bf16
      vh = v[k_rows, cols]                                      # (nk, dh) bf16
      s = jnp.dot(qh, kh_t, preferred_element_type=jnp.float32)  # (nq, nk) f32
      s = s - jnp.max(s, axis=-1, keepdims=True)
      e = jnp.exp(s)
      inv = pl.reciprocal(jnp.sum(e, axis=-1, keepdims=True), approx=True)
      p = (e * inv).astype(jnp.bfloat16)
      head_outs.append(jnp.dot(p, vh, preferred_element_type=jnp.float32))
    row_outs.append(jnp.concatenate(head_outs, axis=-1))        # (nq, in_dim) f32
  attn_out = jnp.concatenate(row_outs, axis=0) if bt > 1 else row_outs[0]

  out = (jnp.dot(attn_out.astype(jnp.bfloat16), wo_ref[...],
                 preferred_element_type=jnp.float32)
         + bo_ref[...])                                         # (bt*nq, dim)
  o_ref[...] = out.reshape(bt, nq, dim).astype(o_ref.dtype)


def axial_attention(query, key, params, *, heads, dim_head, block_b=1,
                    block_q=None, out_dtype=jnp.float32):
  b, n, dim = query.shape
  in_dim = heads * dim_head
  if block_q is None:
    block_q = n
  assert b % block_b == 0, "block_b must divide batch"
  assert n % block_q == 0, "block_q must divide seq len"
  scale = dim_head ** (-0.5)

  # Fold the 1/sqrt(dim_head) scale into the Q projection; fuse Wk|Wv; cast
  # all MXU weights to bf16 once, outside the kernel.
  wq = (params["wq"] * scale).astype(jnp.bfloat16)
  bq = (params["bq"] * scale).astype(jnp.float32)
  wkv = jnp.concatenate([params["wk"], params["wv"]], axis=1).astype(jnp.bfloat16)
  bkv = jnp.concatenate([params["bk"], params["bv"]], axis=1).astype(jnp.float32)
  wo = params["wo"].astype(jnp.bfloat16)
  bo = params["bo"].astype(jnp.float32)

  kernel = functools.partial(
      _axial_attention_kernel, heads=heads, dim_head=dim_head)

  # Constant operands (LN params, weights): whole-array resident in VMEM with a
  # single buffer -- their block index never changes across the grid, so
  # blocked specs would only add useless double-buffering.
  vmem_resident = pl.BlockSpec(memory_space=pltpu.MemorySpace.VMEM)

  grid = (b // block_b, n // block_q)

  grid_spec = pltpu.PrefetchScalarGridSpec(
      num_scalar_prefetch=0,
      grid=grid,
      in_specs=[
          pl.BlockSpec((block_b, block_q, dim), lambda i, j: (i, j, 0)),  # query
          pl.BlockSpec((block_b, n, dim), lambda i, j: (i, 0, 0)),        # key (full seq)
          vmem_resident, vmem_resident,   # LN gamma, beta
          vmem_resident, vmem_resident,   # Wq*scale, bq*scale
          vmem_resident, vmem_resident,   # [Wk|Wv], [bk|bv]
          vmem_resident, vmem_resident,   # Wo, bo
      ],
      out_specs=pl.BlockSpec((block_b, block_q, dim), lambda i, j: (i, j, 0)),
  )

  out_itemsize = jnp.dtype(out_dtype).itemsize
  # VMEM budget: double-buffered pipelined tiles + single-buffered resident
  # weights + rough in-kernel temporaries, with headroom; clamp to the v7x
  # 64 MiB physical ceiling.
  tile_bytes = 2 * block_b * (block_q * dim * 4 + n * dim * 4
                              + block_q * dim * out_itemsize)
  weight_bytes = ((dim * in_dim + dim * 2 * in_dim + in_dim * dim) * 2
                  + (in_dim + 2 * in_dim + dim + 2 * dim) * 4)
  temp_bytes = (block_b * block_q * (dim + 3 * in_dim)
                + block_b * n * (dim + 4 * in_dim)
                + 3 * block_q * n
                + block_b * block_q * in_dim) * 4
  vmem_limit = int(1.5 * (tile_bytes + weight_bytes + temp_bytes)) + (2 << 20)
  vmem_limit = min(max(vmem_limit, 16 << 20), 64 << 20)

  flops = (2 * b * n * dim * in_dim            # Q projection
           + 2 * b * n * dim * 2 * in_dim      # fused KV projection
           + 2 * b * n * in_dim * dim          # output projection
           + 4 * b * heads * n * n * dim_head  # QK^T + PV
           + 10 * b * n * dim)                 # LayerNorm-ish
  cost = pl.CostEstimate(
      flops=flops,
      transcendentals=b * heads * n * n,
      bytes_accessed=(2 * b * n * dim * 4          # query + key reads (f32)
                      + b * n * dim * out_itemsize  # output write
                      + weight_bytes))

  return pl.pallas_call(
      kernel,
      out_shape=jax.ShapeDtypeStruct((b, n, dim), out_dtype),
      grid_spec=grid_spec,
      compiler_params=pltpu.CompilerParams(
          dimension_semantics=("parallel", "parallel"),
          vmem_limit_bytes=vmem_limit),
      cost_estimate=cost,
  )(query, key,
    params["gamma"], params["beta"],
    wq, bq, wkv, bkv, wo, bo)


def axial_attention_ref(query, key, params, *, heads, dim_head):
  """Pure-JAX f32 reference for correctness checking."""
  b, n, dim = query.shape
  scale = dim_head ** (-0.5)

  def ln(x):
    mu = jnp.mean(x, axis=-1, keepdims=True)
    var = jnp.mean(jnp.square(x - mu), axis=-1, keepdims=True)
    return (x - mu) * jax.lax.rsqrt(var + LN_EPS) * params["gamma"] + params["beta"]

  xq, xk = ln(query), ln(key)
  q = xq @ params["wq"] + params["bq"]
  k = xk @ params["wk"] + params["bk"]
  v = xk @ params["wv"] + params["bv"]
  q = q.reshape(b, n, heads, dim_head).transpose(0, 2, 1, 3)
  k = k.reshape(b, n, heads, dim_head).transpose(0, 2, 1, 3)
  v = v.reshape(b, n, heads, dim_head).transpose(0, 2, 1, 3)
  dots = jnp.einsum("bhid,bhjd->bhij", q, k) * scale
  attn = jax.nn.softmax(dots, axis=-1)
  out = jnp.einsum("bhij,bhjd->bhid", attn, v)
  out = out.transpose(0, 2, 1, 3).reshape(b, n, heads * dim_head)
  return out @ params["wo"] + params["bo"]


def make_params(key, dim, heads, dim_head):
  in_dim = heads * dim_head
  ks = jax.random.split(key, 6)
  s = 0.02
  return {
      "gamma": jnp.ones((1, dim), jnp.float32),
      "beta": jnp.zeros((1, dim), jnp.float32),
      "wq": s * jax.random.normal(ks[0], (dim, in_dim), jnp.float32),
      "bq": s * jax.random.normal(ks[1], (1, in_dim), jnp.float32),
      "wk": s * jax.random.normal(ks[2], (dim, in_dim), jnp.float32),
      "bk": s * jax.random.normal(ks[3], (1, in_dim), jnp.float32),
      "wv": s * jax.random.normal(ks[4], (dim, in_dim), jnp.float32),
      "bv": s * jax.random.normal(ks[5], (1, in_dim), jnp.float32),
      "wo": s * jax.random.normal(jax.random.fold_in(key, 7), (in_dim, dim), jnp.float32),
      "bo": s * jax.random.normal(jax.random.fold_in(key, 8), (1, dim), jnp.float32),
  }


if __name__ == "__main__":
  b, n, dim = 2, 8, 32
  heads, dim_head = 4, 8

  root = jax.random.PRNGKey(0)
  kq, kk, kp = jax.random.split(root, 3)
  query = jax.random.normal(kq, (b, n, dim), jnp.float32)
  key_in = jax.random.normal(kk, (b, n, dim), jnp.float32)
  params = make_params(kp, dim, heads, dim_head)

  ref = axial_attention_ref(query, key_in, params, heads=heads, dim_head=dim_head)

  # Default tiling: one batch row per grid step.
  out = axial_attention(query, key_in, params, heads=heads, dim_head=dim_head,
                        block_b=1)
  out = jax.block_until_ready(out)
  # bf16 MXU inputs + approx reciprocal -> relaxed tolerance vs f32 reference.
  np.testing.assert_allclose(np.asarray(out), np.asarray(ref), atol=5e-3, rtol=5e-2)

  # Multi-row tile path (block_b=2) exercises the in-kernel batch concat.
  out2 = axial_attention(query, key_in, params, heads=heads, dim_head=dim_head,
                         block_b=2)
  out2 = jax.block_until_ready(out2)
  np.testing.assert_allclose(np.asarray(out2), np.asarray(ref), atol=5e-3, rtol=5e-2)

  print("KERNEL_OK")
</pallas_src>

<mosaic_0001>
module attributes {stable_mosaic.version = 11 : i64} {
  func.func @_axial_attention_kernel(%arg0: i32, %arg1: i32, %arg2: memref<1x8x32xf32, #tpu.memory_space<vmem>>, %arg3: memref<1x8x32xf32, #tpu.memory_space<vmem>>, %arg4: memref<1x32xf32, #tpu.memory_space<vmem>>, %arg5: memref<1x32xf32, #tpu.memory_space<vmem>>, %arg6: memref<32x32xbf16, #tpu.memory_space<vmem>>, %arg7: memref<1x32xf32, #tpu.memory_space<vmem>>, %arg8: memref<32x64xbf16, #tpu.memory_space<vmem>>, %arg9: memref<1x64xf32, #tpu.memory_space<vmem>>, %arg10: memref<32x32xbf16, #tpu.memory_space<vmem>>, %arg11: memref<1x32xf32, #tpu.memory_space<vmem>>, %arg12: memref<1x8x32xf32, #tpu.memory_space<vmem>>) attributes {dimension_semantics = [#tpu.dimension_semantics<parallel>, #tpu.dimension_semantics<parallel>], iteration_bounds = array<i64: 2, 1>, scalar_prefetch = 0 : i64, scratch_operands = 0 : i64, tpu.core_type = #tpu.core_type<tc>, window_params = [{transform_indices = @transform_0, window_bounds = array<i64: 1, 8, 32>}, {transform_indices = @transform_1, window_bounds = array<i64: 1, 8, 32>}, {pipeline_mode = #tpu.pipeline_mode<synchronous>, transform_indices = @transform_2, window_bounds = array<i64: 1, 32>}, {pipeline_mode = #tpu.pipeline_mode<synchronous>, transform_indices = @transform_3, window_bounds = array<i64: 1, 32>}, {pipeline_mode = #tpu.pipeline_mode<synchronous>, transform_indices = @transform_4, window_bounds = array<i64: 32, 32>}, {pipeline_mode = #tpu.pipeline_mode<synchronous>, transform_indices = @transform_5, window_bounds = array<i64: 1, 32>}, {pipeline_mode = #tpu.pipeline_mode<synchronous>, transform_indices = @transform_6, window_bounds = array<i64: 32, 64>}, {pipeline_mode = #tpu.pipeline_mode<synchronous>, transform_indices = @transform_7, window_bounds = array<i64: 1, 64>}, {pipeline_mode = #tpu.pipeline_mode<synchronous>, transform_indices = @transform_8, window_bounds = array<i64: 32, 32>}, {pipeline_mode = #tpu.pipeline_mode<synchronous>, transform_indices = @transform_9, window_bounds = array<i64: 1, 32>}, {transform_indices = @transform_10, window_bounds = array<i64: 1, 8, 32>}]} {
    %c0 = arith.constant 0 : index
    %c0_0 = arith.constant 0 : index
    %c0_1 = arith.constant 0 : index
    %0 = vector.load %arg2[%c0, %c0_0, %c0_1] : memref<1x8x32xf32, #tpu.memory_space<vmem>>, vector<1x8x32xf32>
    %1 = vector.shape_cast %0 : vector<1x8x32xf32> to vector<8x32xf32>
    %c0_2 = arith.constant 0 : index
    %c0_3 = arith.constant 0 : index
    %c0_4 = arith.constant 0 : index
    %2 = vector.load %arg3[%c0_2, %c0_3, %c0_4] : memref<1x8x32xf32, #tpu.memory_space<vmem>>, vector<1x8x32xf32>
    %3 = vector.shape_cast %2 : vector<1x8x32xf32> to vector<8x32xf32>
    %c0_5 = arith.constant 0 : index
    %c0_6 = arith.constant 0 : index
    %4 = vector.load %arg4[%c0_5, %c0_6] : memref<1x32xf32, #tpu.memory_space<vmem>>, vector<1x32xf32>
    %c0_7 = arith.constant 0 : index
    %c0_8 = arith.constant 0 : index
    %5 = vector.load %arg5[%c0_7, %c0_8] : memref<1x32xf32, #tpu.memory_space<vmem>>, vector<1x32xf32>
    %cst = arith.constant dense<0.000000e+00> : vector<8xf32>
    %6 = vector.multi_reduction <add>, %1, %cst [1] : vector<8x32xf32> to vector<8xf32>
    %7 = vector.shape_cast %6 : vector<8xf32> to vector<8x1xf32>
    %cst_9 = arith.constant 3.200000e+01 : f32
    %8 = vector.broadcast %cst_9 : f32 to vector<8x1xf32>
    %9 = arith.divf %7, %8 : vector<8x1xf32>
    %10 = vector.broadcast %9 : vector<8x1xf32> to vector<8x32xf32>
    %11 = arith.subf %1, %10 : vector<8x32xf32>
    %12 = arith.mulf %11, %11 : vector<8x32xf32>
    %cst_10 = arith.constant dense<0.000000e+00> : vector<8xf32>
    %13 = vector.multi_reduction <add>, %12, %cst_10 [1] : vector<8x32xf32> to vector<8xf32>
    %14 = vector.shape_cast %13 : vector<8xf32> to vector<8x1xf32>
    %cst_11 = arith.constant 3.200000e+01 : f32
    %15 = vector.broadcast %cst_11 : f32 to vector<8x1xf32>
    %16 = arith.divf %14, %15 : vector<8x1xf32>
    %17 = vector.broadcast %9 : vector<8x1xf32> to vector<8x32xf32>
    %18 = arith.subf %1, %17 : vector<8x32xf32>
    %cst_12 = arith.constant 9.99999974E-6 : f32
    %19 = vector.broadcast %cst_12 : f32 to vector<8x1xf32>
    %20 = arith.addf %16, %19 : vector<8x1xf32>
    %21 = math.rsqrt %20 : vector<8x1xf32>
    %22 = vector.broadcast %21 : vector<8x1xf32> to vector<8x32xf32>
    %23 = arith.mulf %18, %22 : vector<8x32xf32>
    %24 = vector.broadcast %4 : vector<1x32xf32> to vector<8x32xf32>
    %25 = arith.mulf %23, %24 : vector<8x32xf32>
    %26 = vector.broadcast %5 : vector<1x32xf32> to vector<8x32xf32>
    %27 = arith.addf %25, %26 : vector<8x32xf32>
    %28 = arith.truncf %27 : vector<8x32xf32> to vector<8x32xbf16>
    %cst_13 = arith.constant dense<0.000000e+00> : vector<8xf32>
    %29 = vector.multi_reduction <add>, %3, %cst_13 [1] : vector<8x32xf32> to vector<8xf32>
    %30 = vector.shape_cast %29 : vector<8xf32> to vector<8x1xf32>
    %cst_14 = arith.constant 3.200000e+01 : f32
    %31 = vector.broadcast %cst_14 : f32 to vector<8x1xf32>
    %32 = arith.divf %30, %31 : vector<8x1xf32>
    %33 = vector.broadcast %32 : vector<8x1xf32> to vector<8x32xf32>
    %34 = arith.subf %3, %33 : vector<8x32xf32>
    %35 = arith.mulf %34, %34 : vector<8x32xf32>
    %cst_15 = arith.constant dense<0.000000e+00> : vector<8xf32>
    %36 = vector.multi_reduction <add>, %35, %cst_15 [1] : vector<8x32xf32> to vector<8xf32>
    %37 = vector.shape_cast %36 : vector<8xf32> to vector<8x1xf32>
    %cst_16 = arith.constant 3.200000e+01 : f32
    %38 = vector.broadcast %cst_16 : f32 to vector<8x1xf32>
    %39 = arith.divf %37, %38 : vector<8x1xf32>
    %40 = vector.broadcast %32 : vector<8x1xf32> to vector<8x32xf32>
    %41 = arith.subf %3, %40 : vector<8x32xf32>
    %cst_17 = arith.constant 9.99999974E-6 : f32
    %42 = vector.broadcast %cst_17 : f32 to vector<8x1xf32>
    %43 = arith.addf %39, %42 : vector<8x1xf32>
    %44 = math.rsqrt %43 : vector<8x1xf32>
    %45 = vector.broadcast %44 : vector<8x1xf32> to vector<8x32xf32>
    %46 = arith.mulf %41, %45 : vector<8x32xf32>
    %47 = vector.broadcast %4 : vector<1x32xf32> to vector<8x32xf32>
    %48 = arith.mulf %46, %47 : vector<8x32xf32>
    %49 = vector.broadcast %5 : vector<1x32xf32> to vector<8x32xf32>
    %50 = arith.addf %48, %49 : vector<8x32xf32>
    %51 = arith.truncf %50 : vector<8x32xf32> to vector<8x32xbf16>
    %c0_18 = arith.constant 0 : index
    %c0_19 = arith.constant 0 : index
    %52 = vector.load %arg6[%c0_18, %c0_19] : memref<32x32xbf16, #tpu.memory_space<vmem>>, vector<32x32xbf16>
    %cst_20 = arith.constant dense<0.000000e+00> : vector<8x32xf32>
    %53 = tpu.matmul %28, %52, %cst_20 {dimension_numbers = #tpu.dot_dimension_numbers<[1], [0], [0], [1], [0, 0, 1, 1], [], []>} : vector<8x32xbf16>, vector<32x32xbf16>, vector<8x32xf32> -> vector<8x32xf32>
    %c0_21 = arith.constant 0 : index
    %c0_22 = arith.constant 0 : index
    %54 = vector.load %arg7[%c0_21, %c0_22] : memref<1x32xf32, #tpu.memory_space<vmem>>, vector<1x32xf32>
    %55 = vector.broadcast %54 : vector<1x32xf32> to vector<8x32xf32>
    %56 = arith.addf %53, %55 : vector<8x32xf32>
    %57 = arith.truncf %56 : vector<8x32xf32> to vector<8x32xbf16>
    %c0_23 = arith.constant 0 : index
    %c0_24 = arith.constant 0 : index
    %58 = vector.load %arg8[%c0_23, %c0_24] : memref<32x64xbf16, #tpu.memory_space<vmem>>, vector<32x64xbf16>
    %cst_25 = arith.constant dense<0.000000e+00> : vector<8x64xf32>
    %59 = tpu.matmul %51, %58, %cst_25 {dimension_numbers = #tpu.dot_dimension_numbers<[1], [0], [0], [1], [0, 0, 1, 1], [], []>} : vector<8x32xbf16>, vector<32x64xbf16>, vector<8x64xf32> -> vector<8x64xf32>
    %c0_26 = arith.constant 0 : index
    %c0_27 = arith.constant 0 : index
    %60 = vector.load %arg9[%c0_26, %c0_27] : memref<1x64xf32, #tpu.memory_space<vmem>>, vector<1x64xf32>
    %61 = vector.broadcast %60 : vector<1x64xf32> to vector<8x64xf32>
    %62 = arith.addf %59, %61 : vector<8x64xf32>
    %63 = vector.extract_strided_slice %62 {offsets = [0, 32], sizes = [8, 32], strides = [1, 1]} : vector<8x64xf32> to vector<8x32xf32>
    %64 = arith.truncf %63 : vector<8x32xf32> to vector<8x32xbf16>
    %65 = vector.extract_strided_slice %62 {offsets = [0, 0], sizes = [8, 32], strides = [1, 1]} : vector<8x64xf32> to vector<8x32xf32>
    %66 = tpu.transpose %65, [1, 0] : vector<8x32xf32> -> vector<32x8xf32>
    %67 = vector.extract_strided_slice %57 {offsets = [0, 0], sizes = [8, 8], strides = [1, 1]} : vector<8x32xbf16> to vector<8x8xbf16>
    %68 = vector.extract_strided_slice %66 {offsets = [0, 0], sizes = [8, 8], strides = [1, 1]} : vector<32x8xf32> to vector<8x8xf32>
    %69 = arith.truncf %68 : vector<8x8xf32> to vector<8x8xbf16>
    %70 = vector.extract_strided_slice %64 {offsets = [0, 0], sizes = [8, 8], strides = [1, 1]} : vector<8x32xbf16> to vector<8x8xbf16>
    %cst_28 = arith.constant dense<0.000000e+00> : vector<8x8xf32>
    %71 = tpu.matmul %67, %69, %cst_28 {dimension_numbers = #tpu.dot_dimension_numbers<[1], [0], [0], [1], [0, 0, 1, 1], [], []>} : vector<8x8xbf16>, vector<8x8xbf16>, vector<8x8xf32> -> vector<8x8xf32>
    %cst_29 = arith.constant dense<0xFF800000> : vector<8xf32>
    %72 = vector.multi_reduction <maximumf>, %71, %cst_29 [1] : vector<8x8xf32> to vector<8xf32>
    %73 = vector.shape_cast %72 : vector<8xf32> to vector<8x1xf32>
    %74 = vector.broadcast %73 : vector<8x1xf32> to vector<8x8xf32>
    %75 = arith.subf %71, %74 : vector<8x8xf32>
    %76 = math.exp %75 : vector<8x8xf32>
    %cst_30 = arith.constant dense<0.000000e+00> : vector<8xf32>
    %77 = vector.multi_reduction <add>, %76, %cst_30 [1] : vector<8x8xf32> to vector<8xf32>
    %78 = vector.shape_cast %77 : vector<8xf32> to vector<8x1xf32>
    %79 = tpu.reciprocal %78 {approx = true} : vector<8x1xf32> -> vector<8x1xf32>
    %80 = vector.broadcast %79 : vector<8x1xf32> to vector<8x8xf32>
    %81 = arith.mulf %76, %80 : vector<8x8xf32>
    %82 = arith.truncf %81 : vector<8x8xf32> to vector<8x8xbf16>
    %cst_31 = arith.constant dense<0.000000e+00> : vector<8x8xf32>
    %83 = tpu.matmul %82, %70, %cst_31 {dimension_numbers = #tpu.dot_dimension_numbers<[1], [0], [0], [1], [0, 0, 1, 1], [], []>} : vector<8x8xbf16>, vector<8x8xbf16>, vector<8x8xf32> -> vector<8x8xf32>
    %84 = vector.extract_strided_slice %57 {offsets = [0, 8], sizes = [8, 8], strides = [1, 1]} : vector<8x32xbf16> to vector<8x8xbf16>
    %85 = vector.extract_strided_slice %66 {offsets = [8, 0], sizes = [8, 8], strides = [1, 1]} : vector<32x8xf32> to vector<8x8xf32>
    %86 = arith.truncf %85 : vector<8x8xf32> to vector<8x8xbf16>
    %87 = vector.extract_strided_slice %64 {offsets = [0, 8], sizes = [8, 8], strides = [1, 1]} : vector<8x32xbf16> to vector<8x8xbf16>
    %cst_32 = arith.constant dense<0.000000e+00> : vector<8x8xf32>
    %88 = tpu.matmul %84, %86, %cst_32 {dimension_numbers = #tpu.dot_dimension_numbers<[1], [0], [0], [1], [0, 0, 1, 1], [], []>} : vector<8x8xbf16>, vector<8x8xbf16>, vector<8x8xf32> -> vector<8x8xf32>
    %cst_33 = arith.constant dense<0xFF800000> : vector<8xf32>
    %89 = vector.multi_reduction <maximumf>, %88, %cst_33 [1] : vector<8x8xf32> to vector<8xf32>
    %90 = vector.shape_cast %89 : vector<8xf32> to vector<8x1xf32>
    %91 = vector.broadcast %90 : vector<8x1xf32> to vector<8x8xf32>
    %92 = arith.subf %88, %91 : vector<8x8xf32>
    %93 = math.exp %92 : vector<8x8xf32>
    %cst_34 = arith.constant dense<0.000000e+00> : vector<8xf32>
    %94 = vector.multi_reduction <add>, %93, %cst_34 [1] : vector<8x8xf32> to vector<8xf32>
    %95 = vector.shape_cast %94 : vector<8xf32> to vector<8x1xf32>
    %96 = tpu.reciprocal %95 {approx = true} : vector<8x1xf32> -> vector<8x1xf32>
    %97 = vector.broadcast %96 : vector<8x1xf32> to vector<8x8xf32>
    %98 = arith.mulf %93, %97 : vector<8x8xf32>
    %99 = arith.truncf %98 : vector<8x8xf32> to vector<8x8xbf16>
    %cst_35 = arith.constant dense<0.000000e+00> : vector<8x8xf32>
    %100 = tpu.matmul %99, %87, %cst_35 {dimension_numbers = #tpu.dot_dimension_numbers<[1], [0], [0], [1], [0, 0, 1, 1], [], []>} : vector<8x8xbf16>, vector<8x8xbf16>, vector<8x8xf32> -> vector<8x8xf32>
    %101 = vector.extract_strided_slice %57 {offsets = [0, 16], sizes = [8, 8], strides = [1, 1]} : vector<8x32xbf16> to vector<8x8xbf16>
    %102 = vector.extract_strided_slice %66 {offsets = [16, 0], sizes = [8, 8], strides = [1, 1]} : vector<32x8xf32> to vector<8x8xf32>
    %103 = arith.truncf %102 : vector<8x8xf32> to vector<8x8xbf16>
    %104 = vector.extract_strided_slice %64 {offsets = [0, 16], sizes = [8, 8], strides = [1, 1]} : vector<8x32xbf16> to vector<8x8xbf16>
    %cst_36 = arith.constant dense<0.000000e+00> : vector<8x8xf32>
    %105 = tpu.matmul %101, %103, %cst_36 {dimension_numbers = #tpu.dot_dimension_numbers<[1], [0], [0], [1], [0, 0, 1, 1], [], []>} : vector<8x8xbf16>, vector<8x8xbf16>, vector<8x8xf32> -> vector<8x8xf32>
    %cst_37 = arith.constant dense<0xFF800000> : vector<8xf32>
    %106 = vector.multi_reduction <maximumf>, %105, %cst_37 [1] : vector<8x8xf32> to vector<8xf32>
    %107 = vector.shape_cast %106 : vector<8xf32> to vector<8x1xf32>
    %108 = vector.broadcast %107 : vector<8x1xf32> to vector<8x8xf32>
    %109 = arith.subf %105, %108 : vector<8x8xf32>
    %110 = math.exp %109 : vector<8x8xf32>
    %cst_38 = arith.constant dense<0.000000e+00> : vector<8xf32>
    %111 = vector.multi_reduction <add>, %110, %cst_38 [1] : vector<8x8xf32> to vector<8xf32>
    %112 = vector.shape_cast %111 : vector<8xf32> to vector<8x1xf32>
    %113 = tpu.reciprocal %112 {approx = true} : vector<8x1xf32> -> vector<8x1xf32>
    %114 = vector.broadcast %113 : vector<8x1xf32> to vector<8x8xf32>
    %115 = arith.mulf %110, %114 : vector<8x8xf32>
    %116 = arith.truncf %115 : vector<8x8xf32> to vector<8x8xbf16>
    %cst_39 = arith.constant dense<0.000000e+00> : vector<8x8xf32>
    %117 = tpu.matmul %116, %104, %cst_39 {dimension_numbers = #tpu.dot_dimension_numbers<[1], [0], [0], [1], [0, 0, 1, 1], [], []>} : vector<8x8xbf16>, vector<8x8xbf16>, vector<8x8xf32> -> vector<8x8xf32>
    %118 = vector.extract_strided_slice %57 {offsets = [0, 24], sizes = [8, 8], strides = [1, 1]} : vector<8x32xbf16> to vector<8x8xbf16>
    %119 = vector.extract_strided_slice %66 {offsets = [24, 0], sizes = [8, 8], strides = [1, 1]} : vector<32x8xf32> to vector<8x8xf32>
    %120 = arith.truncf %119 : vector<8x8xf32> to vector<8x8xbf16>
    %121 = vector.extract_strided_slice %64 {offsets = [0, 24], sizes = [8, 8], strides = [1, 1]} : vector<8x32xbf16> to vector<8x8xbf16>
    %cst_40 = arith.constant dense<0.000000e+00> : vector<8x8xf32>
    %122 = tpu.matmul %118, %120, %cst_40 {dimension_numbers = #tpu.dot_dimension_numbers<[1], [0], [0], [1], [0, 0, 1, 1], [], []>} : vector<8x8xbf16>, vector<8x8xbf16>, vector<8x8xf32> -> vector<8x8xf32>
    %cst_41 = arith.constant dense<0xFF800000> : vector<8xf32>
    %123 = vector.multi_reduction <maximumf>, %122, %cst_41 [1] : vector<8x8xf32> to vector<8xf32>
    %124 = vector.shape_cast %123 : vector<8xf32> to vector<8x1xf32>
    %125 = vector.broadcast %124 : vector<8x1xf32> to vector<8x8xf32>
    %126 = arith.subf %122, %125 : vector<8x8xf32>
    %127 = math.exp %126 : vector<8x8xf32>
    %cst_42 = arith.constant dense<0.000000e+00> : vector<8xf32>
    %128 = vector.multi_reduction <add>, %127, %cst_42 [1] : vector<8x8xf32> to vector<8xf32>
    %129 = vector.shape_cast %128 : vector<8xf32> to vector<8x1xf32>
    %130 = tpu.reciprocal %129 {approx = true} : vector<8x1xf32> -> vector<8x1xf32>
    %131 = vector.broadcast %130 : vector<8x1xf32> to vector<8x8xf32>
    %132 = arith.mulf %127, %131 : vector<8x8xf32>
    %133 = arith.truncf %132 : vector<8x8xf32> to vector<8x8xbf16>
    %cst_43 = arith.constant dense<0.000000e+00> : vector<8x8xf32>
    %134 = tpu.matmul %133, %121, %cst_43 {dimension_numbers = #tpu.dot_dimension_numbers<[1], [0], [0], [1], [0, 0, 1, 1], [], []>} : vector<8x8xbf16>, vector<8x8xbf16>, vector<8x8xf32> -> vector<8x8xf32>
    %135 = tpu.concatenate %83, %100, %117, %134 in 1 : vector<8x8xf32>, vector<8x8xf32>, vector<8x8xf32>, vector<8x8xf32> -> vector<8x32xf32>
    %136 = arith.truncf %135 : vector<8x32xf32> to vector<8x32xbf16>
    %c0_44 = arith.constant 0 : index
    %c0_45 = arith.constant 0 : index
    %137 = vector.load %arg10[%c0_44, %c0_45] : memref<32x32xbf16, #tpu.memory_space<vmem>>, vector<32x32xbf16>
    %cst_46 = arith.constant dense<0.000000e+00> : vector<8x32xf32>
    %138 = tpu.matmul %136, %137, %cst_46 {dimension_numbers = #tpu.dot_dimension_numbers<[1], [0], [0], [1], [0, 0, 1, 1], [], []>} : vector<8x32xbf16>, vector<32x32xbf16>, vector<8x32xf32> -> vector<8x32xf32>
    %c0_47 = arith.constant 0 : index
    %c0_48 = arith.constant 0 : index
    %139 = vector.load %arg11[%c0_47, %c0_48] : memref<1x32xf32, #tpu.memory_space<vmem>>, vector<1x32xf32>
    %140 = vector.broadcast %139 : vector<1x32xf32> to vector<8x32xf32>
    %141 = arith.addf %138, %140 : vector<8x32xf32>
    %142 = vector.shape_cast %141 : vector<8x32xf32> to vector<1x8x32xf32>
    %c0_49 = arith.constant 0 : index
    %c0_50 = arith.constant 0 : index
    %c0_51 = arith.constant 0 : index
    %143 = vector.load %arg12[%c0_49, %c0_50, %c0_51] : memref<1x8x32xf32, #tpu.memory_space<vmem>>, vector<1x8x32xf32>
    tpu.vector_store %arg12[%c0_49, %c0_50, %c0_51], %142 {strides = array<i32>} : memref<1x8x32xf32, #tpu.memory_space<vmem>>, vector<1x8x32xf32>,
    return
  }
  func.func @transform_0(%arg0: i32, %arg1: i32) -> (i32, i32, i32) {
    %c0_i32 = arith.constant 0 : i32
    %c0_i32_0 = arith.constant 0 : i32
    return %arg0, %arg1, %c0_i32 : i32, i32, i32
  }
  func.func @transform_1(%arg0: i32, %arg1: i32) -> (i32, i32, i32) {
    %c0_i32 = arith.constant 0 : i32
    %c0_i32_0 = arith.constant 0 : i32
    %c0_i32_1 = arith.constant 0 : i32
    return %arg0, %c0_i32, %c0_i32_0 : i32, i32, i32
  }
  func.func @transform_2(%arg0: i32, %arg1: i32) -> (i32, i32) {
    %c0_i32 = arith.constant 0 : i32
    %c0_i32_0 = arith.constant 0 : i32
    %c0_i32_1 = arith.constant 0 : i32
    return %c0_i32, %c0_i32_0 : i32, i32
  }
  func.func @transform_3(%arg0: i32, %arg1: i32) -> (i32, i32) {
    %c0_i32 = arith.constant 0 : i32
    %c0_i32_0 = arith.constant 0 : i32
    %c0_i32_1 = arith.constant 0 : i32
    return %c0_i32, %c0_i32_0 : i32, i32
  }
  func.func @transform_4(%arg0: i32, %arg1: i32) -> (i32, i32) {
    %c0_i32 = arith.constant 0 : i32
    %c0_i32_0 = arith.constant 0 : i32
    %c0_i32_1 = arith.constant 0 : i32
    return %c0_i32, %c0_i32_0 : i32, i32
  }
  func.func @transform_5(%arg0: i32, %arg1: i32) -> (i32, i32) {
    %c0_i32 = arith.constant 0 : i32
    %c0_i32_0 = arith.constant 0 : i32
    %c0_i32_1 = arith.constant 0 : i32
    return %c0_i32, %c0_i32_0 : i32, i32
  }
  func.func @transform_6(%arg0: i32, %arg1: i32) -> (i32, i32) {
    %c0_i32 = arith.constant 0 : i32
    %c0_i32_0 = arith.constant 0 : i32
    %c0_i32_1 = arith.constant 0 : i32
    return %c0_i32, %c0_i32_0 : i32, i32
  }
  func.func @transform_7(%arg0: i32, %arg1: i32) -> (i32, i32) {
    %c0_i32 = arith.constant 0 : i32
    %c0_i32_0 = arith.constant 0 : i32
    %c0_i32_1 = arith.constant 0 : i32
    return %c0_i32, %c0_i32_0 : i32, i32
  }
  func.func @transform_8(%arg0: i32, %arg1: i32) -> (i32, i32) {
    %c0_i32 = arith.constant 0 : i32
    %c0_i32_0 = arith.constant 0 : i32
    %c0_i32_1 = arith.constant 0 : i32
    return %c0_i32, %c0_i32_0 : i32, i32
  }
  func.func @transform_9(%arg0: i32, %arg1: i32) -> (i32, i32) {
    %c0_i32 = arith.constant 0 : i32
    %c0_i32_0 = arith.constant 0 : i32
    %c0_i32_1 = arith.constant 0 : i32
    return %c0_i32, %c0_i32_0 : i32, i32
  }
  func.func @transform_10(%arg0: i32, %arg1: i32) -> (i32, i32, i32) {
    %c0_i32 = arith.constant 0 : i32
    %c0_i32_0 = arith.constant 0 : i32
    return %arg0, %arg1, %c0_i32 : i32, i32, i32
  }
}

</mosaic_0001>

<bundles_post_ra>
// kernel: tpu_custom_call.1
= control target key start
LH: loop header
LB: loop body
LE: loop exit
PB: predicated region body
PF: predicated region fallthrough
CT: control target
= control target key end

     0   :  { %s2267_s0 = inlined_call_operand.hbm [shape: f32[2,8,32], index: 0, kind: input, shape index: {}]   ;;  %s2268_s1 = inlined_call_operand.hbm [shape: f32[2,8,32], index: 1, kind: input, shape index: {}]   ;;  %s2269_s2 = inlined_call_operand.vmem [shape: f32[1,32], index: 2, kind: input, shape index: {}]   ;;  %s2270_s3 = inlined_call_operand.vmem [shape: f32[1,32], index: 3, kind: input, shape index: {}]   ;;  %s2271_s4 = inlined_call_operand.hbm [shape: bf16[32,32], index: 4, kind: input, shape index: {}]   ;;  %s2272_s5 = inlined_call_operand.vmem [shape: f32[1,32], index: 5, kind: input, shape index: {}]   ;;  %s2273_s6 = inlined_call_operand.vmem [shape: bf16[32,64], index: 6, kind: input, shape index: {}]   ;;  %s2274_s7 = inlined_call_operand.vmem [shape: f32[1,64], index: 7, kind: input, shape index: {}]   ;;  %s2275_s8 = inlined_call_operand.hbm [shape: bf16[32,32], index: 8, kind: input, shape index: {}]   ;;  %s2276_s9 = inlined_call_operand.vmem [shape: f32[1,32], index: 9, kind: input, shape index: {}]   ;;  %s2277_s10 = inlined_call_operand.hbm [shape: f32[2,8,32], index: 10, kind: output, shape index: {}]  }
   0x1   :  { %2287 = sst [smem:[#allocation21_spill]] %s2271_s4 }
   0x2   :  { %2288 = sst [smem:[#allocation22_spill]] %s2275_s8 }
   0x3   :  { %2289 = sst [smem:[#allocation23_spill]] %s2276_s9 }
   0x4   :  { %2290 = sst [smem:[#allocation24_spill]] %s2277_s10 }
   0x5   :  { %15 = vsyncpa [#allocation3], 0 }
   0x6   :  { %17 = vsyncpa [#allocation3 + $0x1], 0 }
   0x7   :  { %18 = vsyncpa [#allocation6], 0 }
   0x8   :  { %20 = vsyncpa [#allocation6 + $0x1], 0 }
   0x9   :  { %21 = vsyncpa [#allocation9], 0 }
   0xa   :  { %22 = vsyncpa [#allocation4], 0 }
   0xb   :  { %24 = vsyncpa [#allocation4 + $0x1], 0  ;;  %s1888_s13 = smov 0   ;;  %s1890_s14 = smov 0  }
   0xc   :  { %s1892_s15 = smov 0   ;;  %s1894_s16 = smov 0  }
   0xd   :  { %s1896_s17 = smov 0   ;;  %s1898_s18 = smov 0  }
   0xe LB: > { %2291 = sst [smem:[#allocation16_spill]] %s1792_s13  ;;  %s1919_s19 = sadd.s32 4294967295, %s1812_s18   ;;  %s1812_s18 = sphi %s1898_s18, %s30_s18   ;;  %s1808_s17 = sphi %s1896_s17, %s2320_s17   ;;  %s1804_s16 = sphi %s1894_s16, %s2319_s16   ;;  %s1800_s15 = sphi %s1892_s15, %s2323_s15   ;;  %s1796_s14 = sphi %s1890_s14, %s2322_s14   ;;  %s1792_s13 = sphi %s1888_s13, %s2321_s13  }
   0xf   : > { %2292 = sst [smem:[#allocation17_spill]] %s1808_s17  ;;  %s1336_s20 = sadd.s32 4294967294, %s1812_s18  }
  0x10   : > { %p64_p0 = scmp.ne.s32.totalorder %s1796_s14, %s1792_s13  ;;  %p2279_p1 = scmp.eq.s32.totalorder %s1919_s19, 0 }
  0x11   : > { %p290_p3 = scmp.eq.s32.totalorder %s1336_s20, 1  ;;  %p1337_p5 = scmp.ge.s32.totalorder %s1812_s18, 1 }
  0x12   : > { %p1928_p4 = por %p2279_p1, %p64_p0  ;;  %p297_p7 = scmp.lt.s32.totalorder %s1812_s18, 3 }
  0x13   : > { %p1933_p6 = por %p290_p3, %p64_p0  ;;  %s1814_s24 = smov [#allocation7]  }
  0x14   : > { %s2293_s21 = scalar_select %p1928_p4, 1, 0 }
  0x15   : > { %s2294_s22 = scalar_select %p1933_p6, 1, 0 }
  0x16   : > { %p1938_p8 = pnand %p1337_p5, %p297_p7  ;;  %s315_s25 = sshll.u32 %s1814_s24, 4  ;;  %s1942_s25 = int_to_ptr.vmem [resolvable:$true] %s315_s25 }
  0x17   : > { %2295 = sst [smem:[#allocation18_spill]] %s2294_s22  ;;  %s1815_s27 = smov [#allocation8]  }
  0x18   : > { %s2296_s23 = scalar_select %p1938_p8, 1, 0 }
  0x19   : > { %p1488_p9 = pneg %p1938_p8  ;;  %s337_s28 = sshll.u32 %s1815_s27, 4  ;;  %s1953_s28 = int_to_ptr.vmem [resolvable:$true] %s337_s28 }
  0x1a   : > { %s2298_s4 = sld [smem:[#allocation21_spill]] }
  0x1b   : > { %p1949_p11 = pnand %p1488_p9, %p2279_p1 }
  0x1d   : > { %p1604_p13 = pneg %p1949_p11 }
  0x20   : > { %s1602_s11 = scalar_lea.hbm %s2298_s4, 256 }
  0x21   : > { %p1603_p12 = scmp.ne.s32.totalorder %s2298_s4, %s1602_s11  ;;  %p1609_p5 = scmp.lt.u32.totalorder %s1602_s11, %s2298_s4 }
  0x23   : > { %p1605_p0 = pnand %p1604_p13, %p1603_p12 }
  0x25   : > { %p1606_p3 = pneg %p1605_p0 }
  0x27   : > { %p1611_p7 = pnand %p1609_p5, %p1606_p3 }
  0x29   : > { %1614 = shalt.err (!%p1611_p7)
}
  0x2a   : > { %s1615_s27 = scalar_lea.vmem %s1942_s25, 256  ;;  %p1623_p2 = scmp.lt.s32.totalorder %s1942_s25, %s1942_s25 }
  0x2b   : > { %p1616_p9 = scmp.ne.s32.totalorder %s1942_s25, %s1615_s27  ;;  %p1624_p12 = scmp.lt.s32.totalorder %s1615_s27, %s1615_s27 }
  0x2d   : > { %p1618_p10 = pnand %p1616_p9, %p1604_p13  ;;  %p1625_p0 = por %p1624_p12, %p1623_p2 }
  0x2f   : > { %p1619_p1 = pneg %p1618_p10 }
  0x31   : > { %p1626_p6 = pnand %p1625_p0, %p1619_p1 }
  0x33   : > { %1629 = shalt.err (!%p1626_p6)
}
  0x34   : > { %s1816_s22 = smov 64   ;;  %s1817_s29 = smov 4  }
  0x35   : > { %1491 = dma.hbm_to_vmem [thread:$0]  (!%p1949_p11), %s2298_s4, 256, %s1942_s25, [#allocation6], %s1816_s22, %s1816_s22, %s1817_s29  }
  0x36   : > { %s2299_s8 = sld [smem:[#allocation22_spill]] }
  0x3c   : > { %s1630_s24 = scalar_lea.hbm %s2299_s8, 256 }
  0x3d   : > { %p1631_p2 = scmp.ne.s32.totalorder %s2299_s8, %s1630_s24  ;;  %p1637_p10 = scmp.lt.u32.totalorder %s1630_s24, %s2299_s8 }
  0x3f   : > { %p1633_p1 = pnand %p1631_p2, %p1604_p13 }
  0x41   : > { %p1634_p6 = pneg %p1633_p1 }
  0x43   : > { %p1639_p3 = pnand %p1637_p10, %p1634_p6 }
  0x45   : > { %1642 = shalt.err (!%p1639_p3)
}
  0x46   : > { %s1643_s25 = scalar_lea.vmem %s1953_s28, 256  ;;  %p1651_p12 = scmp.lt.s32.totalorder %s1953_s28, %s1953_s28 }
  0x47   : > { %p1644_p5 = scmp.ne.s32.totalorder %s1953_s28, %s1643_s25  ;;  %p1652_p0 = scmp.lt.s32.totalorder %s1643_s25, %s1643_s25 }
  0x49   : > { %p1646_p7 = pnand %p1644_p5, %p1604_p13  ;;  %p1653_p2 = por %p1652_p0, %p1651_p12 }
  0x4b   : > { %p1647_p9 = pneg %p1646_p7 }
  0x4d   : > { %p1654_p1 = pnand %p1653_p2, %p1647_p9 }
  0x4f   : > { %1657 = shalt.err (!%p1654_p1)
}
  0x50   : > { %1494 = dma.hbm_to_vmem [thread:$0]  (!%p1949_p11), %s2299_s8, 256, %s1953_s28, [#allocation9], %s1816_s22, %s1816_s22, %s1817_s29  }
  0x51   : > { %s42_s13 = sadd.s32 1, %s1808_s17  ;;  %s51_s30 = sadd.s32 1, %s1800_s15 }
  0x52   : > { %p44_p13 = scmp.ge.s32.totalorder %s42_s13, 2  ;;  %p58_p6 = scmp.ne.s32.totalorder %s1800_s15, %s1796_s14 }
  0x53   : > { %p59_p10 = scmp.eq.s32.totalorder %s1812_s18, 0  ;;  %p1508_p3 = scmp.lt.s32.totalorder %s1812_s18, 2 }
  0x54   : > { %s2325_s13 = smov (%p44_p13, %s42_s13), 0  ;;  %p2301_p7 = scmp.eq.s32.totalorder %s1919_s19, 1 }
  0x55   : > { %2300 = sst [smem:[#allocation19_spill]] %s2325_s13  ;;  %p60_p5 = por %p59_p10, %p58_p6 }
  0x56   : > { %p2017_p9 = por %p2301_p7, %p58_p6  ;;  %s46_s11 = ssub.s32 %s1808_s17, %s2325_s13 }
  0x57   : > { %s354_s12 = sand.u32 1, %s1800_s15   ;;  %p49_p12 = scmp.eq.s32.totalorder %s46_s11, 0 }
  0x58   : > { %s2302_s26 = scalar_select %p2017_p9, 1, 0 }
  0x59   : > { %s2024_s28 = sshll.u32 %s354_s12, 3  ;;  %s1342_s22 = sshll.u32 %s1808_s17, 7 }
  0x5a   : > { %s2028_s29 = scalar_select %p49_p12, %s1800_s15, %s51_s30  }
  0x5b   : > { %s2033_s27 = scalar_lea.hbm %s2267_s0, %s1342_s22  ;;  %s358_s25 = scalar_lea.vmem [#allocation2], %s2024_s28 }
  0x5c   : > { %2303 = sst [smem:[#allocation20_spill]] %s2028_s29  ;;  %s366_s9 = sshll.u32 %s358_s25, 4  ;;  %s2042_s9 = int_to_ptr.vmem [resolvable:$true] %s366_s9 }
  0x5d   : > { %p2038_p11 = pnand %p1508_p3, %p60_p5  ;;  %s2047_s20 = scalar_lea.hbm %s2268_s1, %s1342_s22 }
  0x5e   : > { %s355_s24 = scalar_lea.sflag [#allocation3], %s354_s12  ;;  %s1658_s4 = scalar_lea.hbm %s2033_s27, 128 }
  0x5f   : > { %p1659_p0 = scmp.ne.s32.totalorder %s2033_s27, %s1658_s4  ;;  %p1660_p2 = pneg %p2038_p11 }
  0x60   : > { %s1663_s13 = scalar_lea.hbm %s2267_s0, 256  ;;  %p1664_p6 = scmp.lt.u32.totalorder %s2033_s27, %s2267_s0 }
  0x61   : > { %p1661_p1 = pnand %p1660_p2, %p1659_p0  ;;  %p1665_p10 = scmp.lt.u32.totalorder %s1663_s13, %s1658_s4 }
  0x62   : > { %p1667_p5 = scmp.lt.u32.totalorder %s1658_s4, %s2033_s27 }
  0x63   : > { %p1662_p13 = pneg %p1661_p1  ;;  %p1666_p3 = por %p1665_p10, %p1664_p6 }
  0x65   : > { %p1668_p7 = por %p1667_p5, %p1666_p3 }
  0x67   : > { %p1669_p12 = pnand %p1668_p7, %p1662_p13 }
  0x69   : > { %1672 = shalt.err (!%p1669_p12)
}
  0x6a   : > { %s1673_s12 = scalar_lea.vmem %s2042_s9, 128  ;;  %s1818_s8 = smov [#allocation2]  }
  0x6b   : > { %p1674_p0 = scmp.ne.s32.totalorder %s2042_s9, %s1673_s12  ;;  %s1678_s22 = sshll.u32 %s1818_s8, 4  ;;  %s1679_s22 = int_to_ptr.vmem [resolvable:$false] %s1678_s22 }
  0x6c   : > { %s1680_s17 = scalar_lea.vmem %s1679_s22, 256  ;;  %p1681_p4 = scmp.lt.s32.totalorder %s2042_s9, %s1679_s22 }
  0x6d   : > { %p1676_p1 = pnand %p1674_p0, %p1660_p2  ;;  %p1682_p6 = scmp.lt.s32.totalorder %s1680_s17, %s1673_s12 }
  0x6f   : > { %p1677_p9 = pneg %p1676_p1  ;;  %p1683_p10 = por %p1682_p6, %p1681_p4 }
  0x71   : > { %p1684_p3 = pnand %p1683_p10, %p1677_p9 }
  0x73   : > { %1687 = shalt.err (!%p1684_p3)
}
  0x74   : > { %1498 = dma.hbm_to_vmem [thread:$0]  (!%p2038_p11), %s2033_s27, 128, %s2042_s9, %s355_s24  }
  0x75   : > { %s373_s4 = sand.u32 1, %s1812_s18   ;;  %s377_s13 = scalar_lea.vmem [#allocation5], %s2024_s28 }
  0x76   : > { %s384_s29 = sshll.u32 %s377_s13, 4  ;;  %s374_s30 = scalar_lea.sflag [#allocation6], %s373_s4  ;;  %s385_s29 = int_to_ptr.vmem [resolvable:$true] %s384_s29 }
  0x77   : > { %s1688_s11 = scalar_lea.hbm %s2047_s20, 128  ;;  %s1693_s8 = scalar_lea.hbm %s2268_s1, 256 }
  0x78   : > { %p1689_p4 = scmp.ne.s32.totalorder %s2047_s20, %s1688_s11  ;;  %p1694_p5 = scmp.lt.u32.totalorder %s2047_s20, %s2268_s1 }
  0x79   : > { %p1695_p7 = scmp.lt.u32.totalorder %s1693_s8, %s1688_s11  ;;  %p1697_p0 = scmp.lt.u32.totalorder %s1688_s11, %s2047_s20 }
  0x7a   : > { %p1691_p9 = pnand %p1689_p4, %p1660_p2 }
  0x7b   : > { %p1696_p12 = por %p1695_p7, %p1694_p5 }
  0x7c   : > { %p1692_p13 = pneg %p1691_p9 }
  0x7d   : > { %p1698_p1 = por %p1697_p0, %p1696_p12 }
  0x7f   : > { %p1699_p6 = pnand %p1698_p1, %p1692_p13 }
  0x81   : > { %1702 = shalt.err (!%p1699_p6)
}
  0x82   : > { %s1703_s28 = scalar_lea.vmem %s385_s29, 128  ;;  %s1819_s27 = smov [#allocation5]  }
  0x83   : > { %p1704_p10 = scmp.ne.s32.totalorder %s385_s29, %s1703_s28  ;;  %s1708_s9 = sshll.u32 %s1819_s27, 4  ;;  %s1709_s9 = int_to_ptr.vmem [resolvable:$false] %s1708_s9 }
  0x84   : > { %s1710_s24 = scalar_lea.vmem %s1709_s9, 256  ;;  %p1711_p9 = scmp.lt.s32.totalorder %s385_s29, %s1709_s9 }
  0x85   : > { %p1706_p3 = pnand %p1704_p10, %p1660_p2  ;;  %p1712_p8 = scmp.lt.s32.totalorder %s1710_s24, %s1703_s28 }
  0x87   : > { %p1707_p4 = pneg %p1706_p3  ;;  %p1713_p5 = por %p1712_p8, %p1711_p9 }
  0x89   : > { %p1714_p7 = pnand %p1713_p5, %p1707_p4 }
  0x8b   : > { %1717 = shalt.err (!%p1714_p7)
}
  0x8c   : > { %1501 = dma.hbm_to_vmem [thread:$0]  (!%p2038_p11), %s2047_s20, 128, %s385_s29, %s374_s30  }
  0x8d   : > { %p2305_p13 = scmp.ne.s32.totalorder %s2296_s23, 0 }
  0x8e   : > { %s2098_s4 = sand.u32 (!%p2305_p13), 1, %s1796_s14   ;;  %p2306_p8 = scmp.ne.s32.totalorder (!%p2305_p13), %s2293_s21, 0 }
  0x8f   : > { %393 = sbr.rel (%p2305_p13) target bundleno = 1980 (0x7bc), region = 60  ;;  %s2101_s13 = sshll.u32 (!%p2305_p13), %s2098_s4, 3 }
  0x90   : > { %s396_s11 = scalar_lea.sflag (!%p2305_p13), [#allocation3], %s2098_s4  ;;  %s399_s25 = scalar_lea.vmem (!%p2305_p13), [#allocation2], %s2101_s13 }
  0x96   : > { %1771 = dma.done.wait (%p2306_p8), %s396_s11, 128  }
  0x97   : > { %1773 = vsyncadd (%p2306_p8), %s396_s11, 4294967168  ;;  %s404_s23 = sand.u32 1, %s1919_s19   ;;  %s408_s20 = scalar_lea.vmem [#allocation5], %s2101_s13 }
  0x98   : > { %s405_s10 = scalar_lea.sflag [#allocation6], %s404_s23 }
  0x99   : > { %1775 = dma.done.wait (%p2306_p8), %s405_s10, 128  }
  0x9a   : > { %1777 = vsyncadd (%p2306_p8), %s405_s10, 4294967168  ;;  %p2307_p11 = scmp.eq.s32.totalorder %s1919_s19, 0 }
  0x9c   : > { %1779 = dma.done.wait (%p2307_p11), [#allocation6], 256   ;;  %p2308_p2 = pmov %p2307_p11 }
  0x9e   : > { %1781 = vsyncadd (%p2308_p2), [#allocation6], 4294967040  ;;  %p2309_p12 = pmov %p2308_p2 }
  0x9f   : > { %p2310_p0 = pmov %p2308_p2 }
  0xa0   : > { %1783 = dma.done.wait (%p2309_p12), [#allocation9], 256  }
  0xa1   : > { %1785 = vsyncadd (%p2310_p0), [#allocation9], 4294967040  ;;  %vm463_vm0 = vcmask 261120   ;;  %v459_v0 = vld [vmem:[%s399_s25] sm:$0xff]  ;;  %v460_v1 = vld [vmem:[%s408_s20] sm:$0xff]  ;;  %v1820_v16 = vmov 0.0  }
  0xa2   : > { %v464_v2 = vsel %vm463_vm0, %v459_v0, 0.0  ;;  %v493_v3 = vsel %vm463_vm0, %v460_v1, 0.0  ;;  %v1576_v14 = vld [vmem:[#allocation7] sm:$0xff]   ;;  %1402 = vmatprep.subr.bf16.mxu0 %v1820_v16  ;;  %1410 = vmatprep.subr.bf16.mxu1 %v1820_v16  ;;  %v1577_v17 = vld [vmem:[#allocation7 + $0x8] sm:$0xff]   ;;  %vm1821_vm1 = vmmov 0   ;;  %s1822_s9 = smov 120  }
  0xa3   : > { %465 = vadd.xlane.f32.xlu0 %v464_v2  ;;  %v1578_v15 = vld [vmem:[%s2273_s6] sm:$0xff]   ;;  %1403 = vmatpush3.bf16.msra.mxu0 %v1576_v14  ;;  %v1579_v18 = vld [vmem:[%s2273_s6 + $0x8] sm:$0xff]   ;;  %s1823_s24 = smov 112   ;;  %s1824_s11 = smov 104   ;;  %vm680_vm2 = vcmask 1043456   ;;  %vm676_vm3 = vcmask 64512  }
  0xa4   : > { %1411 = vmatpush3.bf16.msra.mxu1 %v1578_v15  ;;  %1404 = vmatprep.subr.bf16.mxu0 %v1820_v16  ;;  %v1351_v26 = vld [vmem:[%s2269_s2] ss:$0 sm:$0xff]  ;;  %s1825_s10 = smov 72   ;;  %s1826_s20 = smov 96   ;;  %vm1126_vm4 = vcmask 130048   ;;  %vm1128_vm5 = vcmask 195584  }
  0xa5   : > { %1406 = vmatprep.mubr.msk.bf16.mxu0 %vm1821_vm1, %v1820_v16  ;;  %1412 = vmatprep.subr.bf16.mxu1 %v1820_v16  ;;  %v1352_v28 = vld [vmem:[%s2270_s3] ss:$0 sm:$0xff]  ;;  %s1827_s19 = smov 88   ;;  %s1828_s21 = smov 80  }
  0xa6   : > { %1414 = vmatprep.mubr.msk.bf16.mxu1 %vm1821_vm1, %v1820_v16  ;;  %v1353_v37 = vld [vmem:[%s2272_s5] ss:$0 sm:$0xff]  ;;  %s1829_s29 = smov 8   ;;  %s1830_s30 = smov 16  }
  0xa7   : > { %494 = vadd.xlane.f32.xlu0 %v493_v3  ;;  %1405 = vmatpush3.bf16.msra.mxu0 %v1577_v17  ;;  %v1357_v48 = vld [vmem:[%s2274_s7] ss:$0 sm:$0xff]  ;;  %s1831_s12 = smov 24   ;;  %s2311_s17 = sld [smem:[#allocation23_spill]] }
  0xa8   : > { %1418 = vmatprep.subr.bf16.mxu0 %v1820_v16  ;;  %1413 = vmatpush3.bf16.msra.mxu1 %v1579_v18  ;;  %s1374_s28 = sshll.u32 %s1804_s16, 7  ;;  %s457_s27 = scalar_lea.vmem [#allocation10], %s2101_s13 }
  0xa9   : > { %1424 = vmatprep.subr.bf16.mxu1 %v1820_v16  ;;  %s2312_s25 = sld [smem:[#allocation24_spill]]  ;;  %s1199_s16 = scalar_lea.sflag [#allocation4], %s2098_s4 }
  0xaa   : > { %p2313_p6 = scmp.ne.s32.totalorder %s2302_s26, 0 }
  0xaf   : > { %s2217_s23 = scalar_lea.hbm %s2312_s25, %s1374_s28 }
 0x130   : > { %v466_v4 = vpop.xlane.xlu0 %465 }
 0x131   : > { %v468_v5 = vmul.f32 0.03125, %v466_v4 }
 0x133   : > { %v469_v6 = vsub.f32 %v459_v0, %v468_v5 }
 0x134   : > { %v495_v7 = vpop.xlane.xlu0 %494 }
 0x135   : > { %v496_v8 = vmul.f32 0.03125, %v495_v7  ;;  %v470_v9 = vmul.f32 %v469_v6, %v469_v6 }
 0x137   : > { %v497_v10 = vsub.f32 %v460_v1, %v496_v8  ;;  %v471_v11 = vsel %vm463_vm0, %v470_v9, 0.0 }
 0x138   : > { %472 = vadd.xlane.f32.xlu1 %v471_v11 }
 0x139   : > { %v498_v12 = vmul.f32 %v497_v10, %v497_v10 }
 0x13b   : > { %v499_v13 = vsel %vm463_vm0, %v498_v12, 0.0 }
 0x13c   : > { %500 = vadd.xlane.f32.xlu1 %v499_v13 }
 0x1c5   : > { %v473_v19 = vpop.xlane.xlu1 %472 }
 0x1c6   : > { %v474_v20 = vmul.f32 0.03125, %v473_v19 }
 0x1c8   : > { %v475_v21 = vadd.f32 1e-05, %v474_v20 }
 0x1c9   : > { %v501_v22 = vpop.xlane.xlu1 %500 }
 0x1ca   : > { %1582 = vrsqrt.f32 %v475_v21  ;;  %v502_v23 = vmul.f32 0.03125, %v501_v22 }
 0x1cc   : > { %v503_v24 = vadd.f32 1e-05, %v502_v23 }
 0x1ce   : > { %1584 = vrsqrt.f32 %v503_v24 }
 0x1d4   : > { %v1583_v25 = vpop.eup %1582 }
 0x1d5   : > { %v477_v27 = vmul.f32 %v1583_v25, %v469_v6 }
 0x1d7   : > { %v484_v29 = vmul.f32 %v1351_v26, %v477_v27 }
 0x1d8   : > { %v1585_v30 = vpop.eup %1584 }
 0x1d9   : > { %v491_v31 = vadd.f32 %v1352_v28, %v484_v29  ;;  %v505_v32 = vmul.f32 %v1585_v30, %v497_v10 }
 0x1db   : > { %v492_v33 = vpack.c.bf16 %v491_v31, %v491_v31  ;;  %v506_v34 = vmul.f32 %v1351_v26, %v505_v32 }
 0x1dd   : > { %1407 = vmatmul.mubr.msk.bf16.vlgmr.msra.gmra.mrb[0].mxu0 %vm463_vm0, %v492_v33  ;;  %v507_v35 = vadd.f32 %v1352_v28, %v506_v34 }
 0x1de   : > { %1420 = vmatprep.mubr.msk.bf16.mxu0 %vm1821_vm1, %v1820_v16 }
 0x1df   : > { %v508_v36 = vpack.c.bf16 %v507_v35, %v507_v35 }
 0x1e1   : > { %1415 = vmatmul.mubr.msk.bf16.vlgmr.msra.gmra.mrb[0].mxu1 %vm463_vm0, %v508_v36 }
 0x1e2   : > { %1426 = vmatprep.mubr.msk.bf16.mxu1 %vm1821_vm1, %v1820_v16 }
 0x2b0   : > { %v569_v38 = vpop.f32.mrb[0].mxu0 }
 0x2b1   : > { %v570_v39 = vadd.f32 %v1353_v37, %v569_v38  ;;  %v1408_v40 = vpop.f32.mrb[1].mxu0 }
 0x2b2   : > { %v572_v41 = vpop.f32.mrb[2].mxu0 }
 0x2b3   : > { %v575_v42 = vpack.c.bf16 %v570_v39, %v570_v39  ;;  %v1409_v43 = vpop.f32.mrb[3].mxu0 }
 0x2b4   : > { %v636_v44 = vpop.f32.mrb[0].mxu1 }
 0x2b5   : > { %787 = vrot.lane.b32.xlu0 %v575_v42, %s1822_s9  ;;  %896 = vrot.lane.b32.xlu1 %v575_v42, %s1823_s24  ;;  %v1416_v45 = vpop.f32.mrb[1].mxu1  ;;  %v637_v49 = vadd.f32 %v1357_v48, %v636_v44  ;;  %s1213_s9 = sshll.u32 %s457_s27, 4  ;;  %s2219_s9 = int_to_ptr.vmem [resolvable:$true] %s1213_s9 }
 0x2b6   : > { %v639_v46 = vpop.f32.mrb[2].mxu1  ;;  %s1718_s13 = scalar_lea.vmem %s2219_s9, 128 }
 0x2b7   : > { %v1417_v47 = vpop.f32.mrb[3].mxu1  ;;  %v642_v22 = vpack.c.bf16 %v637_v49, %v637_v49  ;;  %p1719_p1 = scmp.ne.s32.totalorder %s2219_s9, %s1718_s13 }
 0x2b9   : > { %1005 = vrot.lane.b32.xlu0 %v575_v42, %s1824_s11  ;;  %p1720_p10 = pnand %p1719_p1, %p2313_p6 }
 0x2bb   : > { %p1721_p3 = pneg %p1720_p10 }
 0x2de   : > { %643 = vxpose.xlu1.b32.start.end [1/1] (short) (narrow) %v637_v49, 32 }
 0x327   : > { %v897_v50 = vpop.permute.xlu1 %896  ;;  %v788_v60 = vpop.permute.xlu0 %787 }
 0x32b   : > { %v1006_v0 = vpop.permute.xlu0 %1005 }
 0x35e   : > { %v659_v51 = vpop.trf.xlu1 }
 0x35f   : > { %v675_v52 = vpack.c.bf16 %v659_v51, %v659_v51 }
 0x361   : > { %v682_v53 = vsel %vm680_vm2, %v675_v52, 0 }
 0x362   : > { %1419 = vmatpush3.bf16.msra.mxu0 %v682_v53  ;;  %v660_v54 = vpop.trf.xlu1 }
 0x363   : > { %v785_v55 = vpack.c.bf16 %v660_v54, %v660_v54  ;;  %1430 = vmatprep.subr.bf16.mxu0 %v1820_v16 }
 0x365   : > { %1421 = vmatmul.mubr.msk.bf16.vlgmr.msra.gmra.mrb[4].mxu0 %vm676_vm3, %v575_v42  ;;  %v793_v56 = vsel %vm680_vm2, %v785_v55, 0 }
 0x366   : > { %1431 = vmatpush3.bf16.msra.mxu0 %v793_v56  ;;  %1432 = vmatprep.mubr.msk.bf16.mxu0 %vm1821_vm1, %v1820_v16  ;;  %v661_v57 = vpop.trf.xlu1 }
 0x367   : > { %v895_v58 = vpack.c.bf16 %v661_v57, %v661_v57  ;;  %1442 = vmatprep.subr.bf16.mxu0 %v1820_v16 }
 0x369   : > { %v902_v59 = vsel %vm680_vm2, %v895_v58, 0 }
 0x36a   : > { %v662_v61 = vpop.trf.xlu1 }
 0x36b   : > { %v1004_v62 = vpack.c.bf16 %v662_v61, %v662_v61 }
 0x36d   : > { %1433 = vmatmul.mubr.msk.bf16.vlgmr.msra.gmra.mrb[8].mxu0 %vm676_vm3, %v788_v60  ;;  %v1011_v63 = vsel %vm680_vm2, %v1004_v62, 0 }
 0x36e   : > { %1443 = vmatpush3.bf16.msra.mxu0 %v902_v59  ;;  %1444 = vmatprep.mubr.msk.bf16.mxu0 %vm1821_vm1, %v1820_v16 }
 0x36f   : > { %1454 = vmatprep.subr.bf16.mxu0 %v1820_v16 }
 0x375   : > { %1445 = vmatmul.mubr.msk.bf16.vlgmr.msra.gmra.mrb[12].mxu0 %vm676_vm3, %v897_v50 }
 0x376   : > { %1455 = vmatpush3.bf16.msra.mxu0 %v1011_v63  ;;  %1456 = vmatprep.mubr.msk.bf16.mxu0 %vm1821_vm1, %v1820_v16 }
 0x377   : > { %1466 = vmatprep.subr.bf16.mxu0 %v1820_v16 }
 0x37d   : > { %1457 = vmatmul.mubr.msk.bf16.vlgmr.msra.gmra.mrb[16].mxu0 %vm676_vm3, %v1006_v0 }
 0x37e   : > { %1470 = vmatprep.mubr.msk.bf16.mxu0 %vm1821_vm1, %v1820_v16 }
 0x438   : > { %v718_v1 = vpop.f32.mrb[4].mxu0 }
 0x439   : > { %v1422_v2 = vpop.f32.mrb[5].mxu0  ;;  %v724_v3 = vsel %vm676_vm3, %v718_v1, -inf }
 0x43a   : > { %725 = vmax.xlane.f32.xlu0 %v724_v3  ;;  %v721_v4 = vpop.f32.mrb[6].mxu0 }
 0x43b   : > { %v1423_v5 = vpop.f32.mrb[7].mxu0 }
 0x440   : > { %v829_v6 = vpop.f32.mrb[8].mxu0 }
 0x441   : > { %v1434_v7 = vpop.f32.mrb[9].mxu0  ;;  %v835_v8 = vsel %vm676_vm3, %v829_v6, -inf }
 0x442   : > { %836 = vmax.xlane.f32.xlu0 %v835_v8  ;;  %v832_v9 = vpop.f32.mrb[10].mxu0  ;;  %v1580_v7 = vld [vmem:[#allocation8] sm:$0xff]  }
 0x443   : > { %v1435_v10 = vpop.f32.mrb[11].mxu0  ;;  %1467 = vmatpush3.bf16.msra.mxu0 %v1580_v7 }
 0x444   : > { %1468 = vmatprep.subr.bf16.mxu0 %v1820_v16 }
 0x448   : > { %v938_v11 = vpop.f32.mrb[12].mxu0 }
 0x449   : > { %v1446_v12 = vpop.f32.mrb[13].mxu0  ;;  %v944_v13 = vsel %vm676_vm3, %v938_v11, -inf }
 0x44a   : > { %945 = vmax.xlane.f32.xlu1 %v944_v13  ;;  %v941_v14 = vpop.f32.mrb[14].mxu0  ;;  %v1581_v12 = vld [vmem:[#allocation8 + $0x8] sm:$0xff]  }
 0x44b   : > { %v1447_v15 = vpop.f32.mrb[15].mxu0  ;;  %1469 = vmatpush3.bf16.msra.mxu0 %v1581_v12 }
 0x450   : > { %v1047_v17 = vpop.f32.mrb[16].mxu0 }
 0x451   : > { %v1458_v18 = vpop.f32.mrb[17].mxu0  ;;  %v1053_v19 = vsel %vm676_vm3, %v1047_v17, -inf }
 0x452   : > { %1054 = vmax.xlane.f32.xlu0 %v1053_v19  ;;  %v1050_v20 = vpop.f32.mrb[18].mxu0 }
 0x453   : > { %v1459_v21 = vpop.f32.mrb[19].mxu0 }
 0x45b   : > { %1065 = vrot.lane.b32.xlu1 %v642_v22, %s1825_s10  ;;  %s1832_s10 = smov [#allocation10]  }
 0x468   : > { %737 = vrot.lane.b32.xlu0 %v642_v22, %s1826_s20  ;;  %s1722_s20 = sshll.u32 %s1832_s10, 4  ;;  %s1723_s20 = int_to_ptr.vmem [resolvable:$false] %s1722_s20 }
 0x469   : > { %p1725_p4 = scmp.lt.s32.totalorder %s2219_s9, %s1723_s20 }
 0x46c   : > { %847 = vrot.lane.b32.xlu0 %v642_v22, %s1827_s19  ;;  %s1724_s19 = scalar_lea.vmem %s1723_s20, 256 }
 0x46d   : > { %p1726_p9 = scmp.lt.s32.totalorder %s1724_s19, %s1718_s13 }
 0x46f   : > { %p1727_p5 = por %p1726_p9, %p1725_p4 }
 0x471   : > { %p1728_p7 = pnand %p1727_p5, %p1721_p3 }
 0x4c7   : > { %v726_v23 = vpop.xlane.xlu0 %725 }
 0x4c8   : > { %v727_v24 = vsub.f32 %v718_v1, %v726_v23 }
 0x4ca   : > { %v728_v25 = vmul.f32 1.442695, %v727_v24 }
 0x4cc   : > { %1586 = vpow2.f32 %v728_v25 }
 0x4cf   : > { %v837_v26 = vpop.xlane.xlu0 %836 }
 0x4d0   : > { %v838_v27 = vsub.f32 %v829_v6, %v837_v26 }
 0x4d2   : > { %v839_v28 = vmul.f32 1.442695, %v838_v27 }
 0x4d4   : > { %1588 = vpow2.f32 %v839_v28  ;;  %v1369_v28 = vld [vmem:[%s2311_s17] ss:$0 sm:$0xff] }
 0x4d6   : > { %v1587_v29 = vpop.eup %1586 }
 0x4d7   : > { %v946_v30 = vpop.xlane.xlu1 %945  ;;  %v730_v31 = vsel %vm676_vm3, %v1587_v29, 0.0 }
 0x4d8   : > { %v947_v32 = vsub.f32 %v938_v11, %v946_v30  ;;  %731 = vadd.xlane.f32.xlu0 %v730_v31 }
 0x4da   : > { %v948_v33 = vmul.f32 1.442695, %v947_v32 }
 0x4db   : > { %v1066_v61 = vpop.permute.xlu1 %1065 }
 0x4dc   : > { %1590 = vpow2.f32 %v948_v33  ;;  %v1071_v63 = vsel %vm680_vm2, %v1066_v61, 0 }
 0x4de   : > { %v1589_v34 = vpop.eup %1588 }
 0x4df   : > { %v1055_v35 = vpop.xlane.xlu0 %1054  ;;  %v841_v36 = vsel %vm676_vm3, %v1589_v34, 0.0 }
 0x4e0   : > { %v1056_v37 = vsub.f32 %v1047_v17, %v1055_v35  ;;  %842 = vadd.xlane.f32.xlu0 %v841_v36 }
 0x4e2   : > { %v1057_v38 = vmul.f32 1.442695, %v1056_v37 }
 0x4e3   : > { %v738_v39 = vpop.permute.xlu0 %737 }
 0x4e4   : > { %1592 = vpow2.f32 %v1057_v38  ;;  %v743_v40 = vsel %vm680_vm2, %v738_v39, 0 }
 0x4e5   : > { %1425 = vmatpush3.bf16.msra.mxu1 %v743_v40 }
 0x4e6   : > { %v1591_v41 = vpop.eup %1590  ;;  %1436 = vmatprep.subr.bf16.mxu1 %v1820_v16 }
 0x4e7   : > { %v950_v42 = vsel %vm676_vm3, %v1591_v41, 0.0  ;;  %v848_v45 = vpop.permute.xlu0 %847 }
 0x4e8   : > { %951 = vadd.xlane.f32.xlu0 %v950_v42  ;;  %v853_v51 = vsel %vm680_vm2, %v848_v45, 0 }
 0x4ee   : > { %v1593_v43 = vpop.eup %1592 }
 0x4ef   : > { %v1059_v44 = vsel %vm676_vm3, %v1593_v43, 0.0 }
 0x4f0   : > { %1060 = vadd.xlane.f32.xlu0 %v1059_v44 }
 0x506   : > { %956 = vrot.lane.b32.xlu0 %v642_v22, %s1828_s21 }
 0x565   : > { %v732_v46 = vpop.xlane.xlu0 %731 }
 0x566   : > { %1594 = vrcp.f32 %v732_v46 }
 0x56d   : > { %v843_v47 = vpop.xlane.xlu0 %842 }
 0x56e   : > { %1596 = vrcp.f32 %v843_v47 }
 0x570   : > { %v1595_v48 = vpop.eup %1594 }
 0x571   : > { %v734_v49 = vmul.f32 %v1595_v48, %v1587_v29 }
 0x573   : > { %v735_v50 = vpack.c.bf16 %v734_v49, %v734_v49 }
 0x575   : > { %1427 = vmatmul.mubr.msk.bf16.vlgmr.msra.gmra.mrb[4].mxu1 %vm676_vm3, %v735_v50  ;;  %v952_v52 = vpop.xlane.xlu0 %951 }
 0x576   : > { %1437 = vmatpush3.bf16.msra.mxu1 %v853_v51  ;;  %1598 = vrcp.f32 %v952_v52  ;;  %1438 = vmatprep.mubr.msk.bf16.mxu1 %vm1821_vm1, %v1820_v16 }
 0x577   : > { %1448 = vmatprep.subr.bf16.mxu1 %v1820_v16 }
 0x578   : > { %v1597_v53 = vpop.eup %1596 }
 0x579   : > { %v845_v54 = vmul.f32 %v1597_v53, %v1589_v34 }
 0x57b   : > { %v846_v55 = vpack.c.bf16 %v845_v54, %v845_v54 }
 0x57d   : > { %1439 = vmatmul.mubr.msk.bf16.vlgmr.msra.gmra.mrb[8].mxu1 %vm676_vm3, %v846_v55  ;;  %v1061_v56 = vpop.xlane.xlu0 %1060 }
 0x57e   : > { %1600 = vrcp.f32 %v1061_v56  ;;  %1450 = vmatprep.mubr.msk.bf16.mxu1 %vm1821_vm1, %v1820_v16 }
 0x580   : > { %v1599_v57 = vpop.eup %1598 }
 0x581   : > { %v954_v58 = vmul.f32 %v1599_v57, %v1591_v41  ;;  %v957_v59 = vpop.permute.xlu0 %956 }
 0x582   : > { %v962_v60 = vsel %vm680_vm2, %v957_v59, 0 }
 0x583   : > { %1449 = vmatpush3.bf16.msra.mxu1 %v962_v60  ;;  %v955_v62 = vpack.c.bf16 %v954_v58, %v954_v58 }
 0x584   : > { %1460 = vmatprep.subr.bf16.mxu1 %v1820_v16 }
 0x586   : > { %1451 = vmatmul.mubr.msk.bf16.vlgmr.msra.gmra.mrb[12].mxu1 %vm676_vm3, %v955_v62 }
 0x587   : > { %1461 = vmatpush3.bf16.msra.mxu1 %v1071_v63  ;;  %1462 = vmatprep.mubr.msk.bf16.mxu1 %vm1821_vm1, %v1820_v16 }
 0x588   : > { %v1601_v0 = vpop.eup %1600 }
 0x589   : > { %v1063_v1 = vmul.f32 %v1601_v0, %v1593_v43 }
 0x58b   : > { %v1064_v2 = vpack.c.bf16 %v1063_v1, %v1063_v1 }
 0x58e   : > { %1463 = vmatmul.mubr.msk.bf16.vlgmr.msra.gmra.mrb[16].mxu1 %vm676_vm3, %v1064_v2 }
 0x648   : > { %v779_v3 = vpop.f32.mrb[4].mxu1 }
 0x649   : > { %v1428_v4 = vpop.f32.mrb[5].mxu1 }
 0x64a   : > { %v782_v5 = vpop.f32.mrb[6].mxu1 }
 0x64b   : > { %v1429_v6 = vpop.f32.mrb[7].mxu1 }
 0x650   : > { %v889_v8 = vpop.f32.mrb[8].mxu1 }
 0x651   : > { %1114 = vrot.lane.b32.xlu0 %v889_v8, %s1829_s29  ;;  %v1440_v9 = vpop.f32.mrb[9].mxu1 }
 0x652   : > { %v892_v10 = vpop.f32.mrb[10].mxu1 }
 0x653   : > { %v1441_v11 = vpop.f32.mrb[11].mxu1 }
 0x659   : > { %v998_v13 = vpop.f32.mrb[12].mxu1 }
 0x65a   : > { %1118 = vrot.lane.b32.xlu0 %v998_v13, %s1830_s30  ;;  %v1452_v14 = vpop.f32.mrb[13].mxu1 }
 0x65b   : > { %v1001_v15 = vpop.f32.mrb[14].mxu1 }
 0x65c   : > { %v1453_v17 = vpop.f32.mrb[15].mxu1 }
 0x661   : > { %v1107_v18 = vpop.f32.mrb[16].mxu1 }
 0x662   : > { %1122 = vrot.lane.b32.xlu0 %v1107_v18, %s1831_s12  ;;  %v1464_v19 = vpop.f32.mrb[17].mxu1 }
 0x663   : > { %v1110_v16 = vpop.f32.mrb[18].mxu1 }
 0x664   : > { %v1465_v20 = vpop.f32.mrb[19].mxu1 }
 0x6c3   : > { %v1115_v21 = vpop.permute.xlu0 %1114 }
 0x6c4   : > { %v1125_v23 = vsel %vm676_vm3, %v779_v3, %v1115_v21 }
 0x6cc   : > { %v1119_v22 = vpop.permute.xlu0 %1118 }
 0x6cd   : > { %v1127_v24 = vsel %vm1126_vm4, %v1125_v23, %v1119_v22 }
 0x6d4   : > { %v1123_v25 = vpop.permute.xlu0 %1122 }
 0x6d5   : > { %v1129_v26 = vsel %vm1128_vm5, %v1127_v24, %v1123_v25 }
 0x6d6   : > { %v1130_v27 = vpack.c.bf16 %v1129_v26, %v1129_v26 }
 0x6d8   : > { %1471 = vmatmul.mubr.msk.bf16.vlgmr.msra.gmra.mrb[20].mxu0 %vm463_vm0, %v1130_v27 }
 0x7ab   : > { %v1191_v29 = vpop.f32.mrb[20].mxu0 }
 0x7ac   : > { %v1192_v30 = vadd.f32 %v1369_v28, %v1191_v29  ;;  %v1472_v31 = vpop.f32.mrb[21].mxu0 }
 0x7ad   : > { %v1194_v32 = vpop.f32.mrb[22].mxu0 }
 0x7ae   : > { %v1473_v33 = vpop.f32.mrb[23].mxu0  ;;  %1197 = vst.msk [vmem:[%s457_s27] sm:$0xff] %vm463_vm0, %v1192_v30 }
 0x7af   : > { %1731 = shalt.err (!%p1728_p7)
}
 0x7b0   : > { %s1732_s4 = scalar_lea.hbm %s2217_s23, 128  ;;  %s1736_s30 = scalar_lea.hbm %s2312_s25, 256 }
 0x7b1   : > { %p1733_p13 = scmp.ne.s32.totalorder %s2217_s23, %s1732_s4  ;;  %p1737_p2 = scmp.lt.u32.totalorder %s2217_s23, %s2312_s25 }
 0x7b2   : > { %p1738_p12 = scmp.lt.u32.totalorder %s1736_s30, %s1732_s4  ;;  %p1740_p1 = scmp.lt.u32.totalorder %s1732_s4, %s2217_s23 }
 0x7b3   : > { %p1734_p8 = pnand %p1733_p13, %p2313_p6 }
 0x7b4   : > { %p1739_p0 = por %p1738_p12, %p1737_p2 }
 0x7b5   : > { %p1735_p11 = pneg %p1734_p8 }
 0x7b6   : > { %p1741_p10 = por %p1740_p1, %p1739_p0 }
 0x7b8   : > { %p1742_p3 = pnand %p1741_p10, %p1735_p11 }
 0x7ba   : > { %1745 = shalt.err (!%p1742_p3)
}
 0x7bb   : > { %1486 = dma.vmem_to_hbm [thread:$0]  (%p2313_p6), %s2219_s9, 128, %s2217_s23, %s1199_s16  }
 0x7bc PF: > { %s2314_s22 = sld [smem:[#allocation16_spill]]  ;;  %s2315_s17 = sld [smem:[#allocation18_spill]] }
 0x7bd   : > { %p2317_p9 = scmp.ge.s32.totalorder %s1812_s18, 2 }
 0x7c2   : > { %s1225_s28 = sand.u32 1, %s2314_s22   ;;  %p2316_p4 = scmp.ne.s32.totalorder %s2315_s17, 0 }
 0x7c3   : > { %s1226_s27 = scalar_lea.sflag [#allocation4], %s1225_s28 }
 0x7c4   : > { %p1503_p5 = pnand %p2317_p9, %p2316_p4 }
 0x7c6   : > { %1787 = dma.done.wait (!%p1503_p5), %s1226_s27, 128  }
 0x7c7   : > { %1789 = vsyncadd (!%p1503_p5), %s1226_s27, 4294967168  ;;  %s30_s18 = sadd.s32 1, %s1812_s18   ;;  %s2318_s26 = sld [smem:[#allocation20_spill]] }
 0x7c8   : > { %p27_p7 = scmp.ge.s32.totalorder %s30_s18, 4   ;;  %s2319_s16 = sld [smem:[#allocation17_spill]] }
 0x7c9   : > { %s2320_s17 = sld [smem:[#allocation19_spill]]  ;;  %s2321_s13 = smov %s1796_s14 }
 0x7ca   : > { %s2322_s14 = smov %s1800_s15  ;;  %29 = sbr.rel (!%p27_p7) target bundleno = 14 (0xe), region = 126 }
 0x7cd   : > { %s2323_s15 = smov %s2318_s26 }
 0x7d1   :  { %1231 = vsyncpa [#allocation3], 1 }
 0x7d2   :  { %1233 = vsyncpa [#allocation3 + $0x1], 1 }
 0x7d3   :  { %1234 = vsyncpa [#allocation6], 1 }
 0x7d4   :  { %1236 = vsyncpa [#allocation6 + $0x1], 1 }
 0x7d5   :  { %1237 = vsyncpa [#allocation9], 1 }
 0x7d6   :  { %1238 = vsyncpa [#allocation4], 1 }
 0x7d7   :  { %1240 = vsyncpa [#allocation4 + $0x1], 1 }

</bundles_post_ra>
